<compile_context>
chip_gen: v7x
topology: tpu7x:2x2x1
jax: 0.10.0
libtpu: 0.0.40
codegen_flags: <defaults>
</compile_context>

<pallas_src>
import functools

import jax
import jax.numpy as jnp
from jax import lax
from jax.experimental import pallas as pl
from jax.experimental.pallas import tpu as pltpu


def _round_up(x, m):
    return ((x + m - 1) // m) * m


def amatrix_kernel(t_ref, m_ref, msq_ref, c_ref, att_ref, *, alpha):
    # t_ref:   (tile_b, rDim)  batch tile of t_i rows (streams over the grid)
    # m_ref:   (k, rDim)       cluster matrix, VMEM-resident across grid steps
    # msq_ref: (1, k)          precomputed ||m_j||^2 per cluster
    # c_ref:   (tile_b, k)     membership weights
    # att_ref: (tile_b, rDim)  attention vectors
    t = t_ref[...]
    m = m_ref[...]
    m_sq = msq_ref[...]

    # Cross term on the MXU: (tile_b, rDim) x (k, rDim)^T -> (tile_b, k).
    # HIGHEST precision: ||t||^2 - 2 t.m + ||m||^2 is cancellation-prone.
    tm = lax.dot_general(
        t, m,
        dimension_numbers=(((1,), (1,)), ((), ())),
        preferred_element_type=jnp.float32,
        precision=lax.Precision.HIGHEST,
    )
    t_sq = jnp.sum(t * t, axis=1, keepdims=True)              # (tile_b, 1)
    # ||t - m||^2 ; clamp tiny negative fp error from the expansion.
    sq = jnp.maximum(t_sq - 2.0 * tm + m_sq, 0.0)             # (tile_b, k)

    base = sq * (1.0 / alpha) + 1.0
    p = -(alpha + 1.0) / 2.0
    if p == -1.0:                               # alpha == 1
        fz = pl.reciprocal(base)
    elif p == -1.5:                             # alpha == 2
        fz = lax.rsqrt(base) * pl.reciprocal(base)
    elif p == -2.0:                             # alpha == 3
        fz = pl.reciprocal(base * base)
    else:                                       # general exponent (EUP)
        fz = jnp.exp(p * jnp.log(base))

    fm = jnp.sum(fz, axis=1, keepdims=True)                   # (tile_b, 1)
    c = fz * pl.reciprocal(fm)                  # exact reciprocal: sum(C)==1
    c_ref[...] = c

    # Attention on the MXU. Convex combination of matrix rows tolerates
    # DEFAULT precision (single-pass bf16 inputs, f32 accumulation).
    att_ref[...] = jnp.dot(
        c, m,
        preferred_element_type=jnp.float32,
        precision=lax.Precision.DEFAULT,
    )


def _choose_tile_b(B, rDim, k, *, max_tile_b=4096, vmem_budget=32 << 20):
    """Pick the batch tile: big (amortize ~0.35us/step), grid>=2 when possible,
    and within a conservative VMEM budget that is safe on every generation."""
    b_ceil = _round_up(max(B, 1), 8)
    tile = min(_round_up(max_tile_b, 8), b_ceil)
    # v7x megacore: keep >= 2 grid steps whenever B allows so the "parallel"
    # batch axis spans both TensorCores (no effect on 1-TC v5e/v6e).
    if b_ceil >= 16:
        tile = min(tile, _round_up((B + 1) // 2, 8))

    def _need(tb):
        # double-buffered t/C/Att tiles + double-buffered resident matrix/m_sq
        return 2 * 4 * tb * (2 * rDim + k) + 2 * 4 * k * rDim + 2 * 4 * k

    while tile > 8 and _need(tile) > vmem_budget:
        tile = _round_up(tile // 2, 8)
    tile = max(tile, 8)
    return tile, _need(tile)


def amatrix_forward_batched(t_batch, matrix, alpha, *, max_tile_b=4096):
    """Batched AMatrix forward: t_batch (B, rDim) -> (C (B, k), Att (B, rDim))."""
    B, rDim = t_batch.shape
    k, rDim2 = matrix.shape
    assert rDim == rDim2

    t32 = t_batch.astype(jnp.float32)
    m32 = matrix.astype(jnp.float32)
    m_sq = jnp.sum(m32 * m32, axis=1)[None, :]                # (1, k), tiny

    tile_b, need_bytes = _choose_tile_b(B, rDim, k, max_tile_b=max_tile_b)
    grid = (pl.cdiv(B, tile_b),)   # partial last block handled by Pallas
    vmem_limit = int(min(max(need_bytes + (4 << 20), 16 << 20), 48 << 20))

    c, att = pl.pallas_call(
        functools.partial(amatrix_kernel, alpha=float(alpha)),
        out_shape=(
            jax.ShapeDtypeStruct((B, k), jnp.float32),
            jax.ShapeDtypeStruct((B, rDim), jnp.float32),
        ),
        grid=grid,
        in_specs=[
            pl.BlockSpec((tile_b, rDim), lambda i: (i, 0)),   # t tile streams
            pl.BlockSpec((k, rDim), lambda i: (0, 0)),        # matrix resident
            pl.BlockSpec((1, k), lambda i: (0, 0)),           # ||m||^2 resident
        ],
        out_specs=(
            pl.BlockSpec((tile_b, k), lambda i: (i, 0)),
            pl.BlockSpec((tile_b, rDim), lambda i: (i, 0)),
        ),
        compiler_params=pltpu.CompilerParams(
            dimension_semantics=("parallel",),
            vmem_limit_bytes=vmem_limit,
        ),
    )(t32, m32, m_sq)
    return c, att


def amatrix_forward(t_i, matrix, alpha):
    """Single-vector forward matching the PyTorch module signature."""
    c, att = amatrix_forward_batched(t_i.reshape(1, -1), matrix, alpha)
    return c[0], att[0]


def amatrix_reference(t_i, matrix, alpha):
    """Pure-JAX reference mirroring the PyTorch module (full f32 precision)."""
    vector_norms = jnp.linalg.norm(t_i[None, :] - matrix, axis=1)
    base = vector_norms ** 2 / alpha + 1.0
    fz = base ** (-(alpha + 1.0) / 2.0)
    fm = jnp.sum(fz)
    c_i = fz / fm
    att = jnp.squeeze(jnp.matmul(c_i.reshape(1, -1), matrix,
                                 precision=jax.lax.Precision.HIGHEST))
    return c_i, att


if __name__ == "__main__":
    # Small shapes consistent with the module: k clusters, rDim-dim repr.
    k, rDim = 8, 32
    key = jax.random.PRNGKey(0)
    k_mat, k_t = jax.random.split(key)
    matrix = jax.random.normal(k_mat, (k, rDim), dtype=jnp.float32)

    # B=16 -> even grid of 2 steps; B=20 -> grid of 2 with a partial last block.
    for B, alphas in ((16, (1.0, 2.0, 3.0, 5.0)), (20, (1.0,))):
        t_batch = jax.random.normal(jax.random.fold_in(k_t, B), (B, rDim),
                                    dtype=jnp.float32)
        for alpha in alphas:
            c_b, att_b = amatrix_forward_batched(t_batch, matrix, alpha)
            jax.block_until_ready((c_b, att_b))

            c_ref_b, att_ref_b = jax.vmap(
                lambda t: amatrix_reference(t, matrix, alpha))(t_batch)
            assert c_b.shape == (B, k) and att_b.shape == (B, rDim)
            assert jnp.allclose(c_b, c_ref_b, atol=1e-4, rtol=1e-4)
            # Att matmul runs at MXU DEFAULT precision (bf16 inputs, f32 acc)
            # per the perf review; tolerance covers bf16 input rounding of a
            # convex combination of N(0,1) rows.
            assert jnp.allclose(att_b, att_ref_b, atol=2e-2, rtol=1e-2)
            assert jnp.allclose(jnp.sum(c_b, axis=1), 1.0, atol=1e-5)

    # Single-vector path (module-equivalent call); exercises a partial block.
    alpha = 1.0
    t_single = jax.random.normal(k_t, (rDim,), dtype=jnp.float32)
    c_1, att_1 = amatrix_forward(t_single, matrix, alpha)
    jax.block_until_ready((c_1, att_1))
    c_1r, att_1r = amatrix_reference(t_single, matrix, alpha)
    assert c_1.shape == (k,) and att_1.shape == (rDim,)
    assert jnp.allclose(c_1, c_1r, atol=1e-4, rtol=1e-4)
    assert jnp.allclose(att_1, att_1r, atol=2e-2, rtol=1e-2)

    print("KERNEL_OK")
</pallas_src>

<mosaic_0001>
module attributes {stable_mosaic.version = 11 : i64} {
  func.func @amatrix_kernel(%arg0: i32, %arg1: memref<8x32xf32, #tpu.memory_space<vmem>>, %arg2: memref<8x32xf32, #tpu.memory_space<vmem>>, %arg3: memref<1x8xf32, #tpu.memory_space<vmem>>, %arg4: memref<8x8xf32, #tpu.memory_space<vmem>>, %arg5: memref<8x32xf32, #tpu.memory_space<vmem>>) attributes {dimension_semantics = [#tpu.dimension_semantics<parallel>], iteration_bounds = array<i64: 2>, scalar_prefetch = 0 : i64, scratch_operands = 0 : i64, tpu.core_type = #tpu.core_type<tc>, window_params = [{transform_indices = @transform_0, window_bounds = array<i64: 8, 32>}, {pipeline_mode = #tpu.pipeline_mode<synchronous>, transform_indices = @transform_1, window_bounds = array<i64: 8, 32>}, {pipeline_mode = #tpu.pipeline_mode<synchronous>, transform_indices = @transform_2, window_bounds = array<i64: 1, 8>}, {transform_indices = @transform_3, window_bounds = array<i64: 8, 8>}, {transform_indices = @transform_4, window_bounds = array<i64: 8, 32>}]} {
    %c0 = arith.constant 0 : index
    %c0_0 = arith.constant 0 : index
    %0 = vector.load %arg1[%c0, %c0_0] : memref<8x32xf32, #tpu.memory_space<vmem>>, vector<8x32xf32>
    %c0_1 = arith.constant 0 : index
    %c0_2 = arith.constant 0 : index
    %1 = vector.load %arg2[%c0_1, %c0_2] : memref<8x32xf32, #tpu.memory_space<vmem>>, vector<8x32xf32>
    %c0_3 = arith.constant 0 : index
    %c0_4 = arith.constant 0 : index
    %2 = vector.load %arg3[%c0_3, %c0_4] : memref<1x8xf32, #tpu.memory_space<vmem>>, vector<1x8xf32>
    %cst = arith.constant dense<0.000000e+00> : vector<8x8xf32>
    %3 = tpu.matmul %0, %1, %cst {dimension_numbers = #tpu.dot_dimension_numbers<[1], [1], [0], [0], [0, 0, 1, 0], [], []>, precision = #tpu.contract_precision<fp32>} : vector<8x32xf32>, vector<8x32xf32>, vector<8x8xf32> -> vector<8x8xf32>
    %4 = arith.mulf %0, %0 : vector<8x32xf32>
    %cst_5 = arith.constant dense<0.000000e+00> : vector<8xf32>
    %5 = vector.multi_reduction <add>, %4, %cst_5 [1] : vector<8x32xf32> to vector<8xf32>
    %6 = vector.shape_cast %5 : vector<8xf32> to vector<8x1xf32>
    %cst_6 = arith.constant 2.000000e+00 : f32
    %7 = vector.broadcast %cst_6 : f32 to vector<8x8xf32>
    %8 = arith.mulf %7, %3 : vector<8x8xf32>
    %9 = vector.broadcast %6 : vector<8x1xf32> to vector<8x8xf32>
    %10 = arith.subf %9, %8 : vector<8x8xf32>
    %11 = vector.broadcast %2 : vector<1x8xf32> to vector<8x8xf32>
    %12 = arith.addf %10, %11 : vector<8x8xf32>
    %cst_7 = arith.constant 0.000000e+00 : f32
    %13 = vector.broadcast %cst_7 : f32 to vector<8x8xf32>
    %14 = arith.maximumf %12, %13 : vector<8x8xf32>
    %cst_8 = arith.constant 1.000000e+00 : f32
    %15 = vector.broadcast %cst_8 : f32 to vector<8x8xf32>
    %16 = arith.mulf %14, %15 : vector<8x8xf32>
    %cst_9 = arith.constant 1.000000e+00 : f32
    %17 = vector.broadcast %cst_9 : f32 to vector<8x8xf32>
    %18 = arith.addf %16, %17 : vector<8x8xf32>
    %19 = tpu.reciprocal %18 : vector<8x8xf32> -> vector<8x8xf32>
    %cst_10 = arith.constant dense<0.000000e+00> : vector<8xf32>
    %20 = vector.multi_reduction <add>, %19, %cst_10 [1] : vector<8x8xf32> to vector<8xf32>
    %21 = vector.shape_cast %20 : vector<8xf32> to vector<8x1xf32>
    %22 = tpu.reciprocal %21 : vector<8x1xf32> -> vector<8x1xf32>
    %23 = vector.broadcast %22 : vector<8x1xf32> to vector<8x8xf32>
    %24 = arith.mulf %19, %23 : vector<8x8xf32>
    %c0_11 = arith.constant 0 : index
    %c0_12 = arith.constant 0 : index
    %25 = vector.load %arg4[%c0_11, %c0_12] : memref<8x8xf32, #tpu.memory_space<vmem>>, vector<8x8xf32>
    tpu.vector_store %arg4[%c0_11, %c0_12], %24 {strides = array<i32>} : memref<8x8xf32, #tpu.memory_space<vmem>>, vector<8x8xf32>,
    %cst_13 = arith.constant dense<0.000000e+00> : vector<8x32xf32>
    %26 = tpu.matmul %24, %1, %cst_13 {dimension_numbers = #tpu.dot_dimension_numbers<[1], [0], [0], [1], [0, 0, 1, 1], [], []>} : vector<8x8xf32>, vector<8x32xf32>, vector<8x32xf32> -> vector<8x32xf32>
    %c0_14 = arith.constant 0 : index
    %c0_15 = arith.constant 0 : index
    %27 = vector.load %arg5[%c0_14, %c0_15] : memref<8x32xf32, #tpu.memory_space<vmem>>, vector<8x32xf32>
    tpu.vector_store %arg5[%c0_14, %c0_15], %26 {strides = array<i32>} : memref<8x32xf32, #tpu.memory_space<vmem>>, vector<8x32xf32>,
    return
  }
  func.func @transform_0(%arg0: i32) -> (i32, i32) {
    %c0_i32 = arith.constant 0 : i32
    %c0_i32_0 = arith.constant 0 : i32
    return %arg0, %c0_i32 : i32, i32
  }
  func.func @transform_1(%arg0: i32) -> (i32, i32) {
    %c0_i32 = arith.constant 0 : i32
    %c0_i32_0 = arith.constant 0 : i32
    %c0_i32_1 = arith.constant 0 : i32
    return %c0_i32, %c0_i32_0 : i32, i32
  }
  func.func @transform_2(%arg0: i32) -> (i32, i32) {
    %c0_i32 = arith.constant 0 : i32
    %c0_i32_0 = arith.constant 0 : i32
    %c0_i32_1 = arith.constant 0 : i32
    return %c0_i32, %c0_i32_0 : i32, i32
  }
  func.func @transform_3(%arg0: i32) -> (i32, i32) {
    %c0_i32 = arith.constant 0 : i32
    %c0_i32_0 = arith.constant 0 : i32
    return %arg0, %c0_i32 : i32, i32
  }
  func.func @transform_4(%arg0: i32) -> (i32, i32) {
    %c0_i32 = arith.constant 0 : i32
    %c0_i32_0 = arith.constant 0 : i32
    return %arg0, %c0_i32 : i32, i32
  }
}

</mosaic_0001>

<bundles_post_ra>
// kernel: tpu_custom_call.1
= control target key start
LH: loop header
LB: loop body
LE: loop exit
PB: predicated region body
PF: predicated region fallthrough
CT: control target
= control target key end

     0   :  { %10 = vsyncpa [#allocation3], 0  ;;  %s1437_s0 = inlined_call_operand.hbm [shape: f32[16,32], index: 0, kind: input, shape index: {}]   ;;  %s1438_s1 = inlined_call_operand.hbm [shape: f32[8,32], index: 1, kind: input, shape index: {}]   ;;  %s1439_s2 = inlined_call_operand.vmem [shape: f32[1,8], index: 2, kind: input, shape index: {}]   ;;  %s1440_s3 = inlined_call_operand.vmem [shape: f32[16,8], index: 3, kind: output, shape index: {0}]   ;;  %s1441_s4 = inlined_call_operand.hbm [shape: f32[16,32], index: 4, kind: output, shape index: {1}]  }
   0x1   :  { %12 = vsyncpa [#allocation3 + $0x1], 0 }
   0x2   :  { %13 = vsyncpa [#allocation6], 0 }
   0x3   :  { %14 = vsyncpa [#allocation4], 0 }
   0x4   :  { %16 = vsyncpa [#allocation4 + $0x1], 0  ;;  %s1213_s15 = smov 0   ;;  %s1215_s16 = smov 0  }
   0x5   :  { %s1217_s17 = smov 0   ;;  %s1219_s18 = smov 0  }
   0x6 LB: > { %s1234_s19 = sadd.s32 4294967295, %s1181_s18   ;;  %s915_s20 = sadd.s32 4294967294, %s1181_s18   ;;  %s1181_s18 = sphi %s1219_s18, %s1465_s18   ;;  %s1177_s17 = sphi %s1217_s17, %s1464_s17   ;;  %s1173_s16 = sphi %s1215_s16, %s1463_s16   ;;  %s1169_s15 = sphi %s1213_s15, %s1462_s15  }
   0x7   : > { %p42_p0 = scmp.ne.s32.totalorder %s1173_s16, %s1169_s15  ;;  %p1442_p1 = scmp.eq.s32.totalorder %s1234_s19, 0 }
   0x8   : > { %p140_p3 = scmp.eq.s32.totalorder %s915_s20, 1  ;;  %p916_p5 = scmp.ge.s32.totalorder %s1181_s18, 1 }
   0x9   : > { %p1243_p4 = por %p1442_p1, %p42_p0  ;;  %p147_p7 = scmp.lt.s32.totalorder %s1181_s18, 3 }
   0xa   : > { %p1248_p6 = por %p140_p3, %p42_p0  ;;  %s1183_s24 = smov [#allocation5]  }
   0xb   : > { %s1445_s21 = scalar_select %p1243_p4, 1, 0 }
   0xc   : > { %s1446_s22 = scalar_select %p1248_p6, 1, 0 }
   0xd   : > { %p1253_p8 = pnand %p916_p5, %p147_p7  ;;  %s160_s25 = sshll.u32 %s1183_s24, 4  ;;  %s161_s25 = int_to_ptr.vmem [resolvable:$true] %s160_s25 }
   0xe   : > { %s1261_s26 = sadd.s32 1, %s1181_s18   ;;  %s29_s30 = sadd.s32 1, %s1177_s17 }
   0xf   : > { %s1447_s23 = scalar_select %p1253_p8, 1, 0 }
  0x10   : > { %p998_p10 = pneg %p1253_p8  ;;  %s26_s28 = ssub.s32 %s1181_s18, %s1261_s26 }
  0x11   : > { %p1271_p12 = scmp.eq.s32.totalorder %s26_s28, 0  ;;  %s1053_s7 = scalar_lea.hbm %s1438_s1, 128 }
  0x12   : > { %p1265_p11 = pnand %p998_p10, %p1442_p1  ;;  %p1054_p0 = scmp.ne.s32.totalorder %s1438_s1, %s1053_s7 }
  0x13   : > { %s1449_s29 = scalar_select %p1271_p12, 1, 0 }
  0x14   : > { %p1055_p3 = pneg %p1265_p11  ;;  %p1060_p10 = scmp.lt.u32.totalorder %s1053_s7, %s1438_s1 }
  0x16   : > { %p1056_p5 = pnand %p1055_p3, %p1054_p0 }
  0x18   : > { %p1057_p7 = pneg %p1056_p5 }
  0x1a   : > { %p1062_p9 = pnand %p1060_p10, %p1057_p7 }
  0x1c   : > { %1065 = shalt.err (!%p1062_p9)
}
  0x1d   : > { %s1066_s12 = scalar_lea.vmem %s161_s25, 128  ;;  %p1074_p6 = scmp.lt.s32.totalorder %s161_s25, %s161_s25 }
  0x1e   : > { %p1067_p1 = scmp.ne.s32.totalorder %s161_s25, %s1066_s12  ;;  %p1075_p4 = scmp.lt.s32.totalorder %s1066_s12, %s1066_s12 }
  0x20   : > { %p1069_p2 = pnand %p1067_p1, %p1055_p3  ;;  %p1076_p8 = por %p1075_p4, %p1074_p6 }
  0x22   : > { %p1070_p13 = pneg %p1069_p2 }
  0x24   : > { %p1077_p12 = pnand %p1076_p8, %p1070_p13 }
  0x26   : > { %1080 = shalt.err (!%p1077_p12)
}
  0x27   : > { %1001 = dma.hbm_to_vmem [thread:$0]  (!%p1265_p11), %s1438_s1, 128, %s161_s25, [#allocation6]  }
  0x28   : > { %p1450_p1 = scmp.ne.s32.totalorder %s1449_s29, 0  ;;  %p37_p2 = scmp.eq.s32.totalorder %s1181_s18, 0 }
  0x29   : > { %p1451_p4 = scmp.ne.s32.totalorder %s1177_s17, %s1173_s16  ;;  %p1452_p6 = scmp.eq.s32.totalorder %s1234_s19, 1 }
  0x2a   : > { %s1297_s20 = scalar_select %p1450_p1, %s1177_s17, %s29_s30  }
  0x2b   : > { %p1305_p8 = por %p1452_p6, %p1451_p4  ;;  %p1011_p9 = scmp.lt.s32.totalorder %s1181_s18, 2 }
  0x2c   : > { %s174_s27 = sand.u32 1, %s1177_s17   ;;  %p1454_p12 = pmov %p1451_p4 }
  0x2d   : > { %s919_s28 = sshll.u32 %s174_s27, 3  ;;  %s920_s5 = sshll.u32 %s1181_s18, 7 }
  0x2e   : > { %p38_p13 = por %p37_p2, %p1454_p12  ;;  %s1318_s25 = scalar_lea.hbm %s1437_s0, %s920_s5 }
  0x2f   : > { %s178_s29 = scalar_lea.vmem [#allocation2], %s919_s28  ;;  %s175_s9 = scalar_lea.sflag [#allocation3], %s174_s27 }
  0x30   : > { %s185_s30 = sshll.u32 %s178_s29, 4  ;;  %p1320_p11 = pnand %p1011_p9, %p38_p13  ;;  %s1324_s30 = int_to_ptr.vmem [resolvable:$true] %s185_s30 }
  0x31   : > { %s1081_s10 = scalar_lea.hbm %s1318_s25, 128  ;;  %s1086_s13 = scalar_lea.hbm %s1437_s0, 256 }
  0x32   : > { %p1082_p0 = scmp.ne.s32.totalorder %s1318_s25, %s1081_s10  ;;  %p1083_p3 = pneg %p1320_p11 }
  0x33   : > { %p1087_p10 = scmp.lt.u32.totalorder %s1318_s25, %s1437_s0  ;;  %p1088_p1 = scmp.lt.u32.totalorder %s1086_s13, %s1081_s10 }
  0x34   : > { %p1084_p5 = pnand %p1083_p3, %p1082_p0  ;;  %p1090_p4 = scmp.lt.u32.totalorder %s1081_s10, %s1318_s25 }
  0x35   : > { %p1089_p2 = por %p1088_p1, %p1087_p10 }
  0x36   : > { %p1085_p7 = pneg %p1084_p5 }
  0x37   : > { %p1091_p6 = por %p1090_p4, %p1089_p2 }
  0x39   : > { %p1092_p9 = pnand %p1091_p6, %p1085_p7 }
  0x3b   : > { %1095 = shalt.err (!%p1092_p9)
}
  0x3c   : > { %s1096_s27 = scalar_lea.vmem %s1324_s30, 128  ;;  %s1184_s5 = smov [#allocation2]  }
  0x3d   : > { %p1097_p12 = scmp.ne.s32.totalorder %s1324_s30, %s1096_s27  ;;  %s1101_s6 = sshll.u32 %s1184_s5, 4  ;;  %s1102_s6 = int_to_ptr.vmem [resolvable:$false] %s1101_s6 }
  0x3e   : > { %s1103_s7 = scalar_lea.vmem %s1102_s6, 256  ;;  %p1104_p5 = scmp.lt.s32.totalorder %s1324_s30, %s1102_s6 }
  0x3f   : > { %p1099_p13 = pnand %p1097_p12, %p1083_p3  ;;  %p1105_p10 = scmp.lt.s32.totalorder %s1103_s7, %s1096_s27 }
  0x41   : > { %p1100_p0 = pneg %p1099_p13  ;;  %p1106_p1 = por %p1105_p10, %p1104_p5 }
  0x43   : > { %p1107_p2 = pnand %p1106_p1, %p1100_p0 }
  0x45   : > { %1110 = shalt.err (!%p1107_p2)
}
  0x46   : > { %1005 = dma.hbm_to_vmem [thread:$0]  (!%p1320_p11), %s1318_s25, 128, %s1324_s30, %s175_s9  }
  0x47   : > { %p1456_p7 = scmp.ne.s32.totalorder %s1447_s23, 0 }
  0x48   : > { %s1354_s29 = sand.u32 (!%p1456_p7), 1, %s1173_s16   ;;  %p1457_p3 = scmp.ne.s32.totalorder (!%p1456_p7), %s1445_s21, 0 }
  0x49   : > { %194 = sbr.rel (%p1456_p7) target bundleno = 734 (0x2de), region = 32  ;;  %s922_s10 = sshll.u32 (!%p1456_p7), %s1354_s29, 3 }
  0x4a   : > { %s197_s11 = scalar_lea.sflag (!%p1456_p7), [#allocation3], %s1354_s29  ;;  %s200_s12 = scalar_lea.vmem (!%p1456_p7), [#allocation2], %s922_s10 }
  0x50   : > { %1156 = dma.done.wait (%p1457_p3), %s197_s11, 128  }
  0x51   : > { %1158 = vsyncadd (%p1457_p3), %s197_s11, 4294967168  ;;  %p1458_p11 = scmp.eq.s32.totalorder %s1234_s19, 0 }
  0x53   : > { %1160 = dma.done.wait (%p1458_p11), [#allocation6], 128   ;;  %p1459_p4 = pmov %p1458_p11 }
  0x54   : > { %v1185_v0 = vmov 0.0   ;;  %vm1186_vm0 = vmmov 0   ;;  %vm240_vm1 = vcmask 261120   ;;  %v238_v1 = vld [vmem:[#allocation5] sm:$0xff]  ;;  %v237_v2 = vld [vmem:[%s200_s12] sm:$0xff]  ;;  %vm709_vm2 = vcmask 64512  }
  0x55   : > { %1162 = vsyncadd (%p1459_p4), [#allocation6], 4294967168  ;;  %956 = vmatprep.subr.mxu0 %v1185_v0  ;;  %958 = vmatprep.mubr.msk.f32.mxu0 %vm1186_vm0, %v1185_v0  ;;  %v245_v3 = vsel %vm240_vm1, %v238_v1, 0  ;;  %v242_v4 = vsel %vm240_vm1, %v237_v2, 0  ;;  %v693_v5 = vmul.f32 %v237_v2, %v237_v2  ;;  %v926_v24 = vld [vmem:[%s1439_s2] ss:$0 sm:$0xff] }
  0x56   : > { %946 = vmatprep.subr.mxu1 %v1185_v0  ;;  %948 = vmatprep.mubr.msk.f32.mxu1 %vm1186_vm0, %v1185_v0  ;;  %v248_v6 = vand.u32 4294901760, %v245_v3  ;;  %v313_v7 = vand.u32 4294901760, %v242_v4  ;;  %p233_p6 = scmp.lt.s32.totalorder %s1234_s19, 1  ;;  %s929_s14 = sshll.u32 %s1234_s19, 7 }
  0x57   : > { %v694_v8 = vsel %vm240_vm1, %v693_v5, 0.0  ;;  %s232_s28 = scalar_lea.vmem [#allocation7], %s922_s10  ;;  %s1392_s7 = scalar_lea.hbm %s1441_s4, %s929_s14 }
  0x58   : > { %v325_v9 = vsub.f32 %v245_v3, %v248_v6  ;;  %v314_v10 = vsub.f32 %v242_v4, %v313_v7  ;;  %947 = vmatpush3.xpose.msra.mxu1 %v248_v6  ;;  %695 = vadd.xlane.f32.xlu0 %v694_v8  ;;  %s234_s25 = scalar_select %p233_p6, %s1234_s19, 1 }
  0x59   : > { %951 = vmatprep.subr.mxu1 %v1185_v0  ;;  %s811_s27 = sshll.u32 %s232_s28, 4  ;;  %s795_s11 = scalar_lea.sflag [#allocation4], %s1354_s29  ;;  %s1394_s27 = int_to_ptr.vmem [resolvable:$true] %s811_s27 }
  0x5a   : > { %957 = vmatpush3.xpose.msra.mxu0 %v325_v9  ;;  %v315_v11 = vand.u32 4294901760, %v314_v10  ;;  %v326_v12 = vand.u32 4294901760, %v325_v9  ;;  %s925_s30 = sshll.u32 %s234_s25, 3  ;;  %s1111_s12 = scalar_lea.vmem %s1394_s27, 128 }
  0x5b   : > { %961 = vmatprep.subr.mxu0 %v1185_v0  ;;  %s236_s13 = scalar_lea.vmem %s1440_s3, %s925_s30  ;;  %p1112_p9 = scmp.ne.s32.totalorder %s1394_s27, %s1111_s12 }
  0x5c   : > { %v316_v13 = vsub.f32 %v314_v10, %v315_v11  ;;  %v327_v14 = vsub.f32 %v325_v9, %v326_v12  ;;  %s1187_s19 = smov [#allocation7]  }
  0x5d   : > { %959 = vmatmul.mubr.f32.vlgmr.msra.gmra.mrb[0].mxu0 %v314_v10  ;;  %p1113_p12 = pnand %p1112_p9, %p1305_p8  ;;  %s1115_s10 = sshll.u32 %s1187_s19, 4  ;;  %s1116_s10 = int_to_ptr.vmem [resolvable:$false] %s1115_s10 }
  0x5e   : > { %962 = vmatpush3.xpose.msra.mxu0 %v248_v6  ;;  %963 = vmatprep.mubr.msk.f32.mxu0 %vm1186_vm0, %v1185_v0  ;;  %v317_v15 = vand.u32 4294901760, %v316_v13  ;;  %v328_v16 = vand.u32 4294901760, %v327_v14  ;;  %s1117_s21 = scalar_lea.vmem %s1116_s10, 256  ;;  %p1118_p0 = scmp.lt.s32.totalorder %s1394_s27, %s1116_s10 }
  0x5f   : > { %966 = vmatprep.subr.mxu0 %v1185_v0  ;;  %p1114_p13 = pneg %p1113_p12  ;;  %p1119_p5 = scmp.lt.s32.totalorder %s1117_s21, %s1111_s12 }
  0x60   : > { %949 = vmatmul.mubr.f32.vlgmr.msra.gmra.mrb[0].mxu1 %v317_v15 }
  0x61   : > { %952 = vmatpush3.xpose.msra.mxu1 %v328_v16  ;;  %953 = vmatprep.mubr.msk.f32.mxu1 %vm1186_vm0, %v1185_v0  ;;  %p1120_p10 = por %p1119_p5, %p1118_p0 }
  0x62   : > { %976 = vmatprep.subr.mxu1 %v1185_v0 }
  0x63   : > { %p1121_p1 = pnand %p1120_p10, %p1114_p13 }
  0x65   : > { %964 = vmatmul.mubr.f32.vlgmr.msra.gmra.mrb[0].mxu0 %v315_v11 }
  0x66   : > { %967 = vmatpush3.xpose.msra.mxu0 %v326_v12  ;;  %968 = vmatprep.mubr.msk.f32.mxu0 %vm1186_vm0, %v1185_v0 }
  0x67   : > { %971 = vmatprep.subr.mxu0 %v1185_v0 }
  0x68   : > { %954 = vmatmul.mubr.f32.vlgmr.msra.gmra.mrb[0].mxu1 %v313_v7 }
  0x69   : > { %977 = vmatpush3.msra.mxu1 %v238_v1  ;;  %978 = vmatprep.mubr.msk.f32.mxu1 %vm1186_vm0, %v1185_v0 }
  0x6d   : > { %969 = vmatmul.mubr.f32.vlgmr.msra.gmra.mrb[0].mxu0 %v313_v7 }
  0x6e   : > { %972 = vmatpush3.xpose.msra.mxu0 %v248_v6  ;;  %973 = vmatprep.mubr.msk.f32.mxu0 %vm1186_vm0, %v1185_v0 }
  0x75   : > { %974 = vmatmul.mubr.f32.vlgmr.msra.gmra.mrb[0].mxu0 %v313_v7 }
  0xe5   : > { %v696_v22 = vpop.xlane.xlu0 %695 }
 0x13b   : > { %v395_v17 = vpop.f32.mrb[0].mxu1 }
 0x13c   : > { %v955_v18 = vpop.f32.mrb[1].mxu1 }
 0x148   : > { %v689_v19 = vpop.f32.mrb[0].mxu0 }
 0x149   : > { %v981_v20 = vadd.f32 %v689_v19, %v395_v17  ;;  %v975_v21 = vpop.f32.mrb[1].mxu0 }
 0x14b   : > { %v697_v23 = vmul.f32 2.0, %v981_v20 }
 0x14d   : > { %v698_v25 = vsub.f32 %v696_v22, %v697_v23 }
 0x14f   : > { %v705_v26 = vadd.f32 %v926_v24, %v698_v25 }
 0x151   : > { %v706_v27 = vmax.f32 %v705_v26, 0.0 }
 0x153   : > { %v707_v28 = vadd.f32 1.0, %v706_v27 }
 0x155   : > { %1049 = vrcp.f32 %v707_v28 }
 0x15f   : > { %v1050_v29 = vpop.eup %1049 }
 0x160   : > { %v710_v30 = vsel %vm709_vm2, %v1050_v29, 0.0 }
 0x161   : > { %711 = vadd.xlane.f32.xlu0 %v710_v30 }
 0x1ee   : > { %v712_v31 = vpop.xlane.xlu0 %711 }
 0x1ef   : > { %1051 = vrcp.f32 %v712_v31 }
 0x1f9   : > { %v1052_v32 = vpop.eup %1051 }
 0x1fa   : > { %v714_v33 = vmul.f32 %v1052_v32, %v1050_v29 }
 0x1fc   : > { %715 = vst.msk [vmem:[%s236_s13] sm:$0xff] %vm709_vm2, %v714_v33  ;;  %979 = vmatmul.mubr.msk.f32.vlgmr.msra.gmra.mrb[2].mxu1 %vm709_vm2, %v714_v33 }
 0x2cf   : > { %v785_v34 = vpop.f32.mrb[2].mxu1 }
 0x2d0   : > { %789 = vst.msk [vmem:[%s232_s28] sm:$0xff] %vm240_vm1, %v785_v34  ;;  %v980_v35 = vpop.f32.mrb[3].mxu1 }
 0x2d1   : > { %1124 = shalt.err (!%p1121_p1)
}
 0x2d2   : > { %s1125_s29 = scalar_lea.hbm %s1392_s7, 128  ;;  %s1129_s30 = scalar_lea.hbm %s1441_s4, 256 }
 0x2d3   : > { %p1126_p2 = scmp.ne.s32.totalorder %s1392_s7, %s1125_s29  ;;  %p1130_p11 = scmp.lt.u32.totalorder %s1392_s7, %s1441_s4 }
 0x2d4   : > { %p1131_p4 = scmp.lt.u32.totalorder %s1129_s30, %s1125_s29  ;;  %p1133_p9 = scmp.lt.u32.totalorder %s1125_s29, %s1392_s7 }
 0x2d5   : > { %p1127_p7 = pnand %p1126_p2, %p1305_p8 }
 0x2d6   : > { %p1132_p6 = por %p1131_p4, %p1130_p11 }
 0x2d7   : > { %p1128_p3 = pneg %p1127_p7 }
 0x2d8   : > { %p1134_p12 = por %p1133_p9, %p1132_p6 }
 0x2da   : > { %p1135_p13 = pnand %p1134_p12, %p1128_p3 }
 0x2dc   : > { %1138 = shalt.err (!%p1135_p13)
}
 0x2dd   : > { %996 = dma.vmem_to_hbm [thread:$0]  (%p1305_p8), %s1394_s27, 128, %s1392_s7, %s795_s11  }
 0x2de PF: > { %s830_s13 = sand.u32 1, %s1169_s15   ;;  %p1460_p0 = scmp.ne.s32.totalorder %s1446_s22, 0 }
 0x2df   : > { %p1461_p5 = scmp.ge.s32.totalorder %s1181_s18, 2  ;;  %s831_s14 = scalar_lea.sflag [#allocation4], %s830_s13 }
 0x2e1   : > { %p1007_p10 = pnand %p1461_p5, %p1460_p0 }
 0x2e3   : > { %1164 = dma.done.wait (!%p1007_p10), %s831_s14, 128  }
 0x2e4   : > { %1166 = vsyncadd (!%p1007_p10), %s831_s14, 4294967168  ;;  %p19_p1 = scmp.ge.s32.totalorder %s1261_s26, 4   ;;  %s1462_s15 = smov %s1173_s16 }
 0x2e5   : > { %s1463_s16 = smov %s1177_s17  ;;  %s1464_s17 = smov %s1297_s20 }
 0x2e6   : > { %s1465_s18 = smov %s1261_s26  ;;  %21 = sbr.rel (!%p19_p1) target bundleno = 6 (0x6), region = 93 }
 0x2ed   :  { %836 = vsyncpa [#allocation3], 1 }
 0x2ee   :  { %838 = vsyncpa [#allocation3 + $0x1], 1 }
 0x2ef   :  { %839 = vsyncpa [#allocation6], 1 }
 0x2f0   :  { %840 = vsyncpa [#allocation4], 1 }
 0x2f1   :  { %842 = vsyncpa [#allocation4 + $0x1], 1 }

</bundles_post_ra>
